<compile_context>
chip_gen: v6e
topology: v6e:2x2x1
jax: 0.10.0
libtpu: 0.0.40
codegen_flags: <defaults>
</compile_context>

<pallas_src>
import functools
import math

import jax
import jax.numpy as jnp
from jax import lax
from jax.experimental import pallas as pl
from jax.experimental.pallas import tpu as pltpu

_MIB = 1 << 20


# ---------------------------------------------------------------------------
# Path 1: VMEM-resident table (small vocab * emb).
# ---------------------------------------------------------------------------
def _resident_embed_kernel(tok_ref, emb_ref, out_ref, *, scale, tile):
    # tok_ref : SMEM (n_pad,) int32   -- all token ids (scalar prefetch)
    # emb_ref : VMEM (vocab, emb)     -- whole table; constant block index so
    #                                    it is DMA'd from HBM only once.
    # out_ref : VMEM (tile, emb)      -- lane-dense output tile
    base = pl.program_id(0) * tile
    # Static Python loop: the destination row j is a compile-time constant;
    # only the table row index is dynamic (dynamic sublane-start load).
    # `tile` is capped at 128 on this path so the unroll stays small.
    for j in range(tile):
        tid = tok_ref[base + j]
        row = emb_ref[pl.ds(tid, 1), :]                      # (1, emb) gather
        out_ref[pl.ds(j, 1), :] = (
            row.astype(jnp.float32) * scale).astype(out_ref.dtype)


# ---------------------------------------------------------------------------
# Path 2: table stays in HBM; per-row DMA gather, double-buffered across steps.
# ---------------------------------------------------------------------------
def _hbm_gather_kernel(tok_ref, emb_hbm, out_ref, buf, sems, *, scale, tile):
    # tok_ref : SMEM (n_pad,) int32   -- token ids (scalar prefetch)
    # emb_hbm : HBM  (vocab, emb)     -- table, never made VMEM resident
    # out_ref : VMEM (tile, emb)      -- output tile
    # buf     : VMEM (2*tile, emb)    -- two landing slots (rows [0,tile) and
    #                                    [tile,2*tile)), double buffer
    # sems    : DMA sems (2,)         -- one per slot; every row copy of a
    #                                    slot signals the same semaphore
    step = pl.program_id(0)
    n_steps = pl.num_programs(0)
    slot = step % 2

    def issue_tile(t, slot_t):
        # Gather rows tok[t*tile : (t+1)*tile] into landing slot `slot_t`.
        src_base = t * tile
        dst_base = slot_t * tile

        def _start(j, carry):
            tid = tok_ref[src_base + j]
            pltpu.make_async_copy(
                emb_hbm.at[pl.ds(tid, 1), :],
                buf.at[pl.ds(dst_base + j, 1), :],
                sems.at[slot_t],
            ).start()
            return carry

        # Unrolled issue loop: lets the LLO scheduler co-issue the SMEM token
        # load, descriptor build and DMA start (review item 3).
        lax.fori_loop(0, tile, _start, 0, unroll=min(8, tile))

    # Prime the pipeline on the first grid step.
    @pl.when(step == 0)
    def _():
        issue_tile(0, 0)

    # Prefetch the next tile into the other slot *before* waiting on this one
    # (review item 1: hides per-row DMA latency behind this step's work).
    @pl.when(step + 1 < n_steps)
    def _():
        issue_tile(step + 1, 1 - slot)

    # Single bulk wait (review item 2): the `tile` row copies into this slot
    # sum to exactly tile*emb*itemsize bytes, which is what one descriptor
    # covering the whole slot waits for (no per-row .wait() loop).
    off = slot * tile
    if tile % 8 == 0:
        off = pl.multiple_of(off, 8)
    slot_view = buf.at[pl.ds(off, tile), :]
    pltpu.make_async_copy(slot_view, slot_view, sems.at[slot]).wait()

    # Scale in f32 (v5e VPU has no bf16 VALU) and store the lane-dense tile.
    vals = buf[pl.ds(off, tile), :]
    out_ref[...] = (vals.astype(jnp.float32) * scale).astype(out_ref.dtype)


# ---------------------------------------------------------------------------
# Wrapper / dispatch.
# ---------------------------------------------------------------------------
def _device_kind() -> str:
    try:
        return jax.devices()[0].device_kind.lower()
    except Exception:
        return ""


def _hw_caps():
    kind = _device_kind()
    is_v7 = ("v7" in kind) or ("tpu7" in kind)
    is_v5e = ("v5e" in kind) or ("v5 lite" in kind) or ("v5lite" in kind)
    if is_v7:
        # 64 MiB VMEM / 2 TCs: smaller resident threshold + tile cap.
        return dict(is_v7=True, resident_bytes=8 * _MIB, work_bytes=10 * _MIB,
                    tile_cap=256, vmem_cap=48 * _MIB)
    if is_v5e:
        # 128 MiB VMEM but ~820 GB/s HBM and a 16 MiB default scoped limit.
        return dict(is_v7=False, resident_bytes=16 * _MIB, work_bytes=10 * _MIB,
                    tile_cap=512, vmem_cap=100 * _MIB)
    return dict(is_v7=False, resident_bytes=16 * _MIB, work_bytes=20 * _MIB,
                tile_cap=512, vmem_cap=100 * _MIB)


def _pick_tile(n: int, cap: int):
    """Pick a token-tile size.

    Prefers (a) a single block covering all n tokens, else (b) the largest
    multiple of 8 <= cap that divides n (no padding, no post-kernel tail-slice
    copy -- review item 5), else (c) `cap` with the token stream padded.
    Returns (tile, n_pad)."""
    cap = max(8, int(cap))
    if n <= cap:
        return n, n
    cap -= cap % 8
    cap = max(cap, 8)
    for t in range(cap, 7, -8):
        if n % t == 0:
            return t, n
    n_pad = pl.cdiv(n, cap) * cap
    return cap, n_pad


def _compiler_params(dim_sems, need_bytes, caps):
    vmem_limit = None
    if need_bytes > 12 * _MIB:      # only raise the scoped limit when needed
        vmem_limit = int(min(need_bytes + 16 * _MIB, caps["vmem_cap"]))
    return pltpu.CompilerParams(dimension_semantics=dim_sems,
                                vmem_limit_bytes=vmem_limit)


def token_embedding(tokens, emb_table, *, max_tokens_per_tile=None,
                    force_path=None):
    """tokens: int array of any shape; emb_table: (vocab, emb).
    Returns tokens.shape + (emb,) = embedding(tokens) * sqrt(emb)."""
    vocab, emb = emb_table.shape
    scale = math.sqrt(emb)
    tok_shape = tokens.shape
    n = int(math.prod(tok_shape)) if tok_shape else 1
    flat = tokens.reshape((n,)).astype(jnp.int32)

    caps = _hw_caps()
    dsize = jnp.dtype(emb_table.dtype).itemsize
    row_bytes = emb * dsize
    table_bytes = vocab * row_bytes

    if force_path is None:
        # Resident fast path when the whole table comfortably fits VMEM; this
        # also covers the "row < 512 B" case where per-row HBM DMAs would be
        # descriptor-issue bound (review items 8-10).
        use_resident = table_bytes <= caps["resident_bytes"]
    else:
        use_resident = (force_path == "resident")

    if use_resident:
        cap = min(128, max_tokens_per_tile or 128)
        tile, n_pad = _pick_tile(n, cap)
        # 2x table (conservative: pipeline may double-buffer the constant
        # input block) + 2 pipeline output buffers.
        need = 2 * table_bytes + 2 * tile * row_bytes
        dim_sems = ((pltpu.CORE_PARALLEL,) if caps["is_v7"] else ("parallel",))
        grid_spec = pltpu.PrefetchScalarGridSpec(
            num_scalar_prefetch=1,                       # token ids -> SMEM
            grid=(n_pad // tile,),
            in_specs=[pl.BlockSpec((vocab, emb), lambda i, tok: (0, 0))],
            out_specs=pl.BlockSpec((tile, emb), lambda i, tok: (i, 0)),
        )
        kernel = functools.partial(_resident_embed_kernel,
                                   scale=scale, tile=tile)
    else:
        cap = min(caps["tile_cap"],
                  max_tokens_per_tile or caps["tile_cap"],
                  max(8, caps["work_bytes"] // (4 * row_bytes)))
        tile, n_pad = _pick_tile(n, cap)
        # 2 landing slots + ~2 pipeline output buffers, all (tile, emb).
        need = 4 * tile * row_bytes
        # Double-buffering carries state across grid steps -> the axis must be
        # sequential ("arbitrary").
        # TODO(synk): per-core pipeline priming would allow CORE_PARALLEL here.
        dim_sems = ("arbitrary",)
        grid_spec = pltpu.PrefetchScalarGridSpec(
            num_scalar_prefetch=1,                       # token ids -> SMEM
            grid=(n_pad // tile,),
            in_specs=[pl.BlockSpec(memory_space=pl.ANY)],  # table stays in HBM
            out_specs=pl.BlockSpec((tile, emb), lambda i, tok: (i, 0)),
            scratch_shapes=[
                pltpu.VMEM((2 * tile, emb), emb_table.dtype),  # 2 landing slots
                pltpu.SemaphoreType.DMA((2,)),                 # 1 sem per slot
            ],
        )
        kernel = functools.partial(_hbm_gather_kernel,
                                   scale=scale, tile=tile)

    if n_pad != n:
        # Only taken when no 8-aligned divisor of n fits under the tile cap:
        # padded slots gather token 0 and are sliced off below.
        flat = jnp.pad(flat, (0, n_pad - n))

    out_flat = pl.pallas_call(
        kernel,
        out_shape=jax.ShapeDtypeStruct((n_pad, emb), emb_table.dtype),
        grid_spec=grid_spec,
        compiler_params=_compiler_params(dim_sems, need, caps),
    )(flat, emb_table)

    if n_pad != n:
        out_flat = out_flat[:n]
    return out_flat.reshape(tok_shape + (emb,))


if __name__ == "__main__":
    key = jax.random.PRNGKey(0)
    k1, k2, k3, k4 = jax.random.split(key, 4)

    # --- demo config of the original module: exercises the resident path ----
    vocab_size, emb_size, seq_len, batch = 32, 128, 8, 2
    emb_table = jax.random.normal(k1, (vocab_size, emb_size), dtype=jnp.float32)
    tokens = jax.random.randint(k2, (seq_len, batch), 0, vocab_size,
                                dtype=jnp.int32)
    out = jax.block_until_ready(token_embedding(tokens, emb_table))
    ref = jnp.take(emb_table, tokens, axis=0) * math.sqrt(emb_size)
    assert out.shape == (seq_len, batch, emb_size)
    assert jnp.allclose(out, ref, atol=1e-5, rtol=1e-5)

    # --- small run forcing the double-buffered HBM-gather path (4 tiles) ----
    vocab2, emb2, seq2, batch2 = 64, 256, 16, 4          # n = 64 tokens
    emb_table2 = jax.random.normal(k3, (vocab2, emb2), dtype=jnp.float32)
    tokens2 = jax.random.randint(k4, (seq2, batch2), 0, vocab2, dtype=jnp.int32)
    out2 = jax.block_until_ready(
        token_embedding(tokens2, emb_table2, force_path="hbm",
                        max_tokens_per_tile=16))
    ref2 = jnp.take(emb_table2, tokens2, axis=0) * math.sqrt(emb2)
    assert out2.shape == (seq2, batch2, emb2)
    assert jnp.allclose(out2, ref2, atol=1e-4, rtol=1e-4)

    print("KERNEL_OK")
</pallas_src>

<mosaic_0001>
module attributes {stable_mosaic.version = 11 : i64} {
  func.func @_resident_embed_kernel(%arg0: i32, %arg1: memref<16xi32, #tpu.memory_space<smem>>, %arg2: memref<32x128xf32, #tpu.memory_space<vmem>>, %arg3: memref<16x128xf32, #tpu.memory_space<vmem>>) attributes {dimension_semantics = [#tpu.dimension_semantics<parallel>], iteration_bounds = array<i64: 1>, scalar_prefetch = 1 : i64, scratch_operands = 0 : i64, tpu.core_type = #tpu.core_type<tc>, window_params = [{pipeline_mode = #tpu.pipeline_mode<synchronous>, transform_indices = @transform_0, window_bounds = array<i64: 32, 128>}, {transform_indices = @transform_1, window_bounds = array<i64: 16, 128>}]} {
    %c16_i32 = arith.constant 16 : i32
    %0 = arith.muli %arg0, %c16_i32 : i32
    %c0_i32 = arith.constant 0 : i32
    %1 = arith.addi %0, %c0_i32 : i32
    %2 = arith.index_cast %1 : i32 to index
    %3 = memref.load %arg1[%2] : memref<16xi32, #tpu.memory_space<smem>>
    %4 = arith.index_cast %3 : i32 to index
    %c0 = arith.constant 0 : index
    %5 = vector.load %arg2[%4, %c0] : memref<32x128xf32, #tpu.memory_space<vmem>>, vector<1x128xf32>
    %cst = arith.constant 11.3137083 : f32
    %6 = vector.broadcast %cst : f32 to vector<1x128xf32>
    %7 = arith.mulf %5, %6 : vector<1x128xf32>
    %c0_0 = arith.constant 0 : index
    %c0_1 = arith.constant 0 : index
    %8 = vector.load %arg3[%c0_0, %c0_1] : memref<16x128xf32, #tpu.memory_space<vmem>>, vector<1x128xf32>
    tpu.vector_store %arg3[%c0_0, %c0_1], %7 {strides = array<i32>} : memref<16x128xf32, #tpu.memory_space<vmem>>, vector<1x128xf32>,
    %c1_i32 = arith.constant 1 : i32
    %9 = arith.addi %0, %c1_i32 : i32
    %10 = arith.index_cast %9 : i32 to index
    %11 = memref.load %arg1[%10] : memref<16xi32, #tpu.memory_space<smem>>
    %12 = arith.index_cast %11 : i32 to index
    %c0_2 = arith.constant 0 : index
    %13 = vector.load %arg2[%12, %c0_2] : memref<32x128xf32, #tpu.memory_space<vmem>>, vector<1x128xf32>
    %cst_3 = arith.constant 11.3137083 : f32
    %14 = vector.broadcast %cst_3 : f32 to vector<1x128xf32>
    %15 = arith.mulf %13, %14 : vector<1x128xf32>
    %c1 = arith.constant 1 : index
    %c0_4 = arith.constant 0 : index
    %16 = vector.load %arg3[%c1, %c0_4] : memref<16x128xf32, #tpu.memory_space<vmem>>, vector<1x128xf32>
    tpu.vector_store %arg3[%c1, %c0_4], %15 {strides = array<i32>} : memref<16x128xf32, #tpu.memory_space<vmem>>, vector<1x128xf32>,
    %c2_i32 = arith.constant 2 : i32
    %17 = arith.addi %0, %c2_i32 : i32
    %18 = arith.index_cast %17 : i32 to index
    %19 = memref.load %arg1[%18] : memref<16xi32, #tpu.memory_space<smem>>
    %20 = arith.index_cast %19 : i32 to index
    %c0_5 = arith.constant 0 : index
    %21 = vector.load %arg2[%20, %c0_5] : memref<32x128xf32, #tpu.memory_space<vmem>>, vector<1x128xf32>
    %cst_6 = arith.constant 11.3137083 : f32
    %22 = vector.broadcast %cst_6 : f32 to vector<1x128xf32>
    %23 = arith.mulf %21, %22 : vector<1x128xf32>
    %c2 = arith.constant 2 : index
    %c0_7 = arith.constant 0 : index
    %24 = vector.load %arg3[%c2, %c0_7] : memref<16x128xf32, #tpu.memory_space<vmem>>, vector<1x128xf32>
    tpu.vector_store %arg3[%c2, %c0_7], %23 {strides = array<i32>} : memref<16x128xf32, #tpu.memory_space<vmem>>, vector<1x128xf32>,
    %c3_i32 = arith.constant 3 : i32
    %25 = arith.addi %0, %c3_i32 : i32
    %26 = arith.index_cast %25 : i32 to index
    %27 = memref.load %arg1[%26] : memref<16xi32, #tpu.memory_space<smem>>
    %28 = arith.index_cast %27 : i32 to index
    %c0_8 = arith.constant 0 : index
    %29 = vector.load %arg2[%28, %c0_8] : memref<32x128xf32, #tpu.memory_space<vmem>>, vector<1x128xf32>
    %cst_9 = arith.constant 11.3137083 : f32
    %30 = vector.broadcast %cst_9 : f32 to vector<1x128xf32>
    %31 = arith.mulf %29, %30 : vector<1x128xf32>
    %c3 = arith.constant 3 : index
    %c0_10 = arith.constant 0 : index
    %32 = vector.load %arg3[%c3, %c0_10] : memref<16x128xf32, #tpu.memory_space<vmem>>, vector<1x128xf32>
    tpu.vector_store %arg3[%c3, %c0_10], %31 {strides = array<i32>} : memref<16x128xf32, #tpu.memory_space<vmem>>, vector<1x128xf32>,
    %c4_i32 = arith.constant 4 : i32
    %33 = arith.addi %0, %c4_i32 : i32
    %34 = arith.index_cast %33 : i32 to index
    %35 = memref.load %arg1[%34] : memref<16xi32, #tpu.memory_space<smem>>
    %36 = arith.index_cast %35 : i32 to index
    %c0_11 = arith.constant 0 : index
    %37 = vector.load %arg2[%36, %c0_11] : memref<32x128xf32, #tpu.memory_space<vmem>>, vector<1x128xf32>
    %cst_12 = arith.constant 11.3137083 : f32
    %38 = vector.broadcast %cst_12 : f32 to vector<1x128xf32>
    %39 = arith.mulf %37, %38 : vector<1x128xf32>
    %c4 = arith.constant 4 : index
    %c0_13 = arith.constant 0 : index
    %40 = vector.load %arg3[%c4, %c0_13] : memref<16x128xf32, #tpu.memory_space<vmem>>, vector<1x128xf32>
    tpu.vector_store %arg3[%c4, %c0_13], %39 {strides = array<i32>} : memref<16x128xf32, #tpu.memory_space<vmem>>, vector<1x128xf32>,
    %c5_i32 = arith.constant 5 : i32
    %41 = arith.addi %0, %c5_i32 : i32
    %42 = arith.index_cast %41 : i32 to index
    %43 = memref.load %arg1[%42] : memref<16xi32, #tpu.memory_space<smem>>
    %44 = arith.index_cast %43 : i32 to index
    %c0_14 = arith.constant 0 : index
    %45 = vector.load %arg2[%44, %c0_14] : memref<32x128xf32, #tpu.memory_space<vmem>>, vector<1x128xf32>
    %cst_15 = arith.constant 11.3137083 : f32
    %46 = vector.broadcast %cst_15 : f32 to vector<1x128xf32>
    %47 = arith.mulf %45, %46 : vector<1x128xf32>
    %c5 = arith.constant 5 : index
    %c0_16 = arith.constant 0 : index
    %48 = vector.load %arg3[%c5, %c0_16] : memref<16x128xf32, #tpu.memory_space<vmem>>, vector<1x128xf32>
    tpu.vector_store %arg3[%c5, %c0_16], %47 {strides = array<i32>} : memref<16x128xf32, #tpu.memory_space<vmem>>, vector<1x128xf32>,
    %c6_i32 = arith.constant 6 : i32
    %49 = arith.addi %0, %c6_i32 : i32
    %50 = arith.index_cast %49 : i32 to index
    %51 = memref.load %arg1[%50] : memref<16xi32, #tpu.memory_space<smem>>
    %52 = arith.index_cast %51 : i32 to index
    %c0_17 = arith.constant 0 : index
    %53 = vector.load %arg2[%52, %c0_17] : memref<32x128xf32, #tpu.memory_space<vmem>>, vector<1x128xf32>
    %cst_18 = arith.constant 11.3137083 : f32
    %54 = vector.broadcast %cst_18 : f32 to vector<1x128xf32>
    %55 = arith.mulf %53, %54 : vector<1x128xf32>
    %c6 = arith.constant 6 : index
    %c0_19 = arith.constant 0 : index
    %56 = vector.load %arg3[%c6, %c0_19] : memref<16x128xf32, #tpu.memory_space<vmem>>, vector<1x128xf32>
    tpu.vector_store %arg3[%c6, %c0_19], %55 {strides = array<i32>} : memref<16x128xf32, #tpu.memory_space<vmem>>, vector<1x128xf32>,
    %c7_i32 = arith.constant 7 : i32
    %57 = arith.addi %0, %c7_i32 : i32
    %58 = arith.index_cast %57 : i32 to index
    %59 = memref.load %arg1[%58] : memref<16xi32, #tpu.memory_space<smem>>
    %60 = arith.index_cast %59 : i32 to index
    %c0_20 = arith.constant 0 : index
    %61 = vector.load %arg2[%60, %c0_20] : memref<32x128xf32, #tpu.memory_space<vmem>>, vector<1x128xf32>
    %cst_21 = arith.constant 11.3137083 : f32
    %62 = vector.broadcast %cst_21 : f32 to vector<1x128xf32>
    %63 = arith.mulf %61, %62 : vector<1x128xf32>
    %c7 = arith.constant 7 : index
    %c0_22 = arith.constant 0 : index
    %64 = vector.load %arg3[%c7, %c0_22] : memref<16x128xf32, #tpu.memory_space<vmem>>, vector<1x128xf32>
    tpu.vector_store %arg3[%c7, %c0_22], %63 {strides = array<i32>} : memref<16x128xf32, #tpu.memory_space<vmem>>, vector<1x128xf32>,
    %c8_i32 = arith.constant 8 : i32
    %65 = arith.addi %0, %c8_i32 : i32
    %66 = arith.index_cast %65 : i32 to index
    %67 = memref.load %arg1[%66] : memref<16xi32, #tpu.memory_space<smem>>
    %68 = arith.index_cast %67 : i32 to index
    %c0_23 = arith.constant 0 : index
    %69 = vector.load %arg2[%68, %c0_23] : memref<32x128xf32, #tpu.memory_space<vmem>>, vector<1x128xf32>
    %cst_24 = arith.constant 11.3137083 : f32
    %70 = vector.broadcast %cst_24 : f32 to vector<1x128xf32>
    %71 = arith.mulf %69, %70 : vector<1x128xf32>
    %c8 = arith.constant 8 : index
    %c0_25 = arith.constant 0 : index
    %72 = vector.load %arg3[%c8, %c0_25] : memref<16x128xf32, #tpu.memory_space<vmem>>, vector<1x128xf32>
    tpu.vector_store %arg3[%c8, %c0_25], %71 {strides = array<i32>} : memref<16x128xf32, #tpu.memory_space<vmem>>, vector<1x128xf32>,
    %c9_i32 = arith.constant 9 : i32
    %73 = arith.addi %0, %c9_i32 : i32
    %74 = arith.index_cast %73 : i32 to index
    %75 = memref.load %arg1[%74] : memref<16xi32, #tpu.memory_space<smem>>
    %76 = arith.index_cast %75 : i32 to index
    %c0_26 = arith.constant 0 : index
    %77 = vector.load %arg2[%76, %c0_26] : memref<32x128xf32, #tpu.memory_space<vmem>>, vector<1x128xf32>
    %cst_27 = arith.constant 11.3137083 : f32
    %78 = vector.broadcast %cst_27 : f32 to vector<1x128xf32>
    %79 = arith.mulf %77, %78 : vector<1x128xf32>
    %c9 = arith.constant 9 : index
    %c0_28 = arith.constant 0 : index
    %80 = vector.load %arg3[%c9, %c0_28] : memref<16x128xf32, #tpu.memory_space<vmem>>, vector<1x128xf32>
    tpu.vector_store %arg3[%c9, %c0_28], %79 {strides = array<i32>} : memref<16x128xf32, #tpu.memory_space<vmem>>, vector<1x128xf32>,
    %c10_i32 = arith.constant 10 : i32
    %81 = arith.addi %0, %c10_i32 : i32
    %82 = arith.index_cast %81 : i32 to index
    %83 = memref.load %arg1[%82] : memref<16xi32, #tpu.memory_space<smem>>
    %84 = arith.index_cast %83 : i32 to index
    %c0_29 = arith.constant 0 : index
    %85 = vector.load %arg2[%84, %c0_29] : memref<32x128xf32, #tpu.memory_space<vmem>>, vector<1x128xf32>
    %cst_30 = arith.constant 11.3137083 : f32
    %86 = vector.broadcast %cst_30 : f32 to vector<1x128xf32>
    %87 = arith.mulf %85, %86 : vector<1x128xf32>
    %c10 = arith.constant 10 : index
    %c0_31 = arith.constant 0 : index
    %88 = vector.load %arg3[%c10, %c0_31] : memref<16x128xf32, #tpu.memory_space<vmem>>, vector<1x128xf32>
    tpu.vector_store %arg3[%c10, %c0_31], %87 {strides = array<i32>} : memref<16x128xf32, #tpu.memory_space<vmem>>, vector<1x128xf32>,
    %c11_i32 = arith.constant 11 : i32
    %89 = arith.addi %0, %c11_i32 : i32
    %90 = arith.index_cast %89 : i32 to index
    %91 = memref.load %arg1[%90] : memref<16xi32, #tpu.memory_space<smem>>
    %92 = arith.index_cast %91 : i32 to index
    %c0_32 = arith.constant 0 : index
    %93 = vector.load %arg2[%92, %c0_32] : memref<32x128xf32, #tpu.memory_space<vmem>>, vector<1x128xf32>
    %cst_33 = arith.constant 11.3137083 : f32
    %94 = vector.broadcast %cst_33 : f32 to vector<1x128xf32>
    %95 = arith.mulf %93, %94 : vector<1x128xf32>
    %c11 = arith.constant 11 : index
    %c0_34 = arith.constant 0 : index
    %96 = vector.load %arg3[%c11, %c0_34] : memref<16x128xf32, #tpu.memory_space<vmem>>, vector<1x128xf32>
    tpu.vector_store %arg3[%c11, %c0_34], %95 {strides = array<i32>} : memref<16x128xf32, #tpu.memory_space<vmem>>, vector<1x128xf32>,
    %c12_i32 = arith.constant 12 : i32
    %97 = arith.addi %0, %c12_i32 : i32
    %98 = arith.index_cast %97 : i32 to index
    %99 = memref.load %arg1[%98] : memref<16xi32, #tpu.memory_space<smem>>
    %100 = arith.index_cast %99 : i32 to index
    %c0_35 = arith.constant 0 : index
    %101 = vector.load %arg2[%100, %c0_35] : memref<32x128xf32, #tpu.memory_space<vmem>>, vector<1x128xf32>
    %cst_36 = arith.constant 11.3137083 : f32
    %102 = vector.broadcast %cst_36 : f32 to vector<1x128xf32>
    %103 = arith.mulf %101, %102 : vector<1x128xf32>
    %c12 = arith.constant 12 : index
    %c0_37 = arith.constant 0 : index
    %104 = vector.load %arg3[%c12, %c0_37] : memref<16x128xf32, #tpu.memory_space<vmem>>, vector<1x128xf32>
    tpu.vector_store %arg3[%c12, %c0_37], %103 {strides = array<i32>} : memref<16x128xf32, #tpu.memory_space<vmem>>, vector<1x128xf32>,
    %c13_i32 = arith.constant 13 : i32
    %105 = arith.addi %0, %c13_i32 : i32
    %106 = arith.index_cast %105 : i32 to index
    %107 = memref.load %arg1[%106] : memref<16xi32, #tpu.memory_space<smem>>
    %108 = arith.index_cast %107 : i32 to index
    %c0_38 = arith.constant 0 : index
    %109 = vector.load %arg2[%108, %c0_38] : memref<32x128xf32, #tpu.memory_space<vmem>>, vector<1x128xf32>
    %cst_39 = arith.constant 11.3137083 : f32
    %110 = vector.broadcast %cst_39 : f32 to vector<1x128xf32>
    %111 = arith.mulf %109, %110 : vector<1x128xf32>
    %c13 = arith.constant 13 : index
    %c0_40 = arith.constant 0 : index
    %112 = vector.load %arg3[%c13, %c0_40] : memref<16x128xf32, #tpu.memory_space<vmem>>, vector<1x128xf32>
    tpu.vector_store %arg3[%c13, %c0_40], %111 {strides = array<i32>} : memref<16x128xf32, #tpu.memory_space<vmem>>, vector<1x128xf32>,
    %c14_i32 = arith.constant 14 : i32
    %113 = arith.addi %0, %c14_i32 : i32
    %114 = arith.index_cast %113 : i32 to index
    %115 = memref.load %arg1[%114] : memref<16xi32, #tpu.memory_space<smem>>
    %116 = arith.index_cast %115 : i32 to index
    %c0_41 = arith.constant 0 : index
    %117 = vector.load %arg2[%116, %c0_41] : memref<32x128xf32, #tpu.memory_space<vmem>>, vector<1x128xf32>
    %cst_42 = arith.constant 11.3137083 : f32
    %118 = vector.broadcast %cst_42 : f32 to vector<1x128xf32>
    %119 = arith.mulf %117, %118 : vector<1x128xf32>
    %c14 = arith.constant 14 : index
    %c0_43 = arith.constant 0 : index
    %120 = vector.load %arg3[%c14, %c0_43] : memref<16x128xf32, #tpu.memory_space<vmem>>, vector<1x128xf32>
    tpu.vector_store %arg3[%c14, %c0_43], %119 {strides = array<i32>} : memref<16x128xf32, #tpu.memory_space<vmem>>, vector<1x128xf32>,
    %c15_i32 = arith.constant 15 : i32
    %121 = arith.addi %0, %c15_i32 : i32
    %122 = arith.index_cast %121 : i32 to index
    %123 = memref.load %arg1[%122] : memref<16xi32, #tpu.memory_space<smem>>
    %124 = arith.index_cast %123 : i32 to index
    %c0_44 = arith.constant 0 : index
    %125 = vector.load %arg2[%124, %c0_44] : memref<32x128xf32, #tpu.memory_space<vmem>>, vector<1x128xf32>
    %cst_45 = arith.constant 11.3137083 : f32
    %126 = vector.broadcast %cst_45 : f32 to vector<1x128xf32>
    %127 = arith.mulf %125, %126 : vector<1x128xf32>
    %c15 = arith.constant 15 : index
    %c0_46 = arith.constant 0 : index
    %128 = vector.load %arg3[%c15, %c0_46] : memref<16x128xf32, #tpu.memory_space<vmem>>, vector<1x128xf32>
    tpu.vector_store %arg3[%c15, %c0_46], %127 {strides = array<i32>} : memref<16x128xf32, #tpu.memory_space<vmem>>, vector<1x128xf32>,
    return
  }
  func.func @transform_0(%arg0: i32, %arg1: memref<16xi32, #tpu.memory_space<smem>>) -> (i32, i32) {
    %c0_i32 = arith.constant 0 : i32
    %c0_i32_0 = arith.constant 0 : i32
    %c0_i32_1 = arith.constant 0 : i32
    return %c0_i32, %c0_i32_0 : i32, i32
  }
  func.func @transform_1(%arg0: i32, %arg1: memref<16xi32, #tpu.memory_space<smem>>) -> (i32, i32) {
    %c0_i32 = arith.constant 0 : i32
    %c0_i32_0 = arith.constant 0 : i32
    return %arg0, %c0_i32 : i32, i32
  }
}

</mosaic_0001>

<bundles_post_ra>
// kernel: tpu_custom_call.1
= control target key start
LH: loop header
LB: loop body
LE: loop exit
PB: predicated region body
PF: predicated region fallthrough
CT: control target
= control target key end

     0   :  { %s231_s9 = smov [#allocation3]   ;;  %s266_s0 = inlined_call_operand.hbm [shape: s32[16], index: 0, kind: input, shape index: {}]   ;;  %s267_s1 = inlined_call_operand.hbm [shape: f32[32,128], index: 1, kind: input, shape index: {}]   ;;  %s268_s2 = inlined_call_operand.hbm [shape: f32[16,128], index: 2, kind: output, shape index: {}]  }
   0x1   :  { %8 = dma.hbm_to_smem %s266_s0, 16, %s231_s9, [#allocation2] }
   0x2   :  { %225 = dma.done.wait [#allocation2], 16 }
   0x3   :  { %226 = vsyncadd [#allocation2], 4294967280 }
   0x4   :  { %10 = sfence }
   0x5   :  { %11 = vsyncpa [#allocation5], 0 }
   0x6   :  { %12 = vsyncpa [#allocation6], 0  ;;  %s232_s12 = smov [#allocation4]  }
   0x7   :  { %s18_s13 = sshll.u32 %s232_s12, 4  ;;  %s19_s13 = int_to_ptr.vmem [resolvable:$true] %s18_s13 }
   0x8   :  { %s193_s14 = scalar_lea.vmem %s19_s13, 512  ;;  %p198_p1 = scmp.lt.s32.totalorder %s19_s13, %s19_s13 }
   0x9   :  { %p194_p0 = scmp.ne.s32.totalorder %s19_s13, %s193_s14  ;;  %p199_p2 = scmp.lt.s32.totalorder %s193_s14, %s193_s14 }
   0xb   :  { %p200_p3 = por %p199_p2, %p198_p1 }
   0xd   :  { %p201_p4 = pnand %p200_p3, %p194_p0 }
   0xf   :  { %204 = shalt.err (!%p201_p4)
}
  0x10   :  { %s233_s15 = smov 128   ;;  %s234_s16 = smov 8  }
  0x11   :  { %24 = dma.hbm_to_vmem [thread:$0]  %s267_s1, 512, %s19_s13, [#allocation5], %s233_s15, %s233_s15, %s234_s16  }
  0x12   :  { %227 = dma.done.wait [#allocation5], 512  }
  0x13   :  { %228 = vsyncadd [#allocation5], 4294966784  ;;  %s29_s18 = sld [smem:[#allocation3]] }
  0x14   :  { %s157_s19 = sld [smem:[#allocation3 + $0x1]] }
  0x15   :  { %s158_s20 = sld [smem:[#allocation3 + $0x2]] }
  0x16   :  { %s159_s21 = sld [smem:[#allocation3 + $0x3]] }
  0x17   :  { %s160_s22 = sld [smem:[#allocation3 + $0x4]] }
  0x18   :  { %s161_s23 = sld [smem:[#allocation3 + $0x5]] }
  0x19   :  { %s162_s24 = sld [smem:[#allocation3 + $0x6]]  ;;  %s30_s25 = scalar_lea.vmem [#allocation4], %s29_s18 }
  0x1a   :  { %v31_v0 = vld [vmem:[%s30_s25] sm:$0x1]  ;;  %s163_s26 = sld [smem:[#allocation3 + $0x7]]  ;;  %s36_s27 = scalar_lea.vmem [#allocation4], %s157_s19 }
  0x1b   :  { %v32_v1 = vmul.f32 11.313708, %v31_v0  ;;  %v37_v2 = vld [vmem:[%s36_s27] sm:$0x1]  ;;  %s42_s28 = scalar_lea.vmem [#allocation4], %s158_s20  ;;  %s164_s5 = sld [smem:[#allocation3 + $0x8]] }
  0x1c   :  { %v38_v3 = vmul.f32 11.313708, %v37_v2  ;;  %v43_v4 = vld [vmem:[%s42_s28] sm:$0x1]  ;;  %s48_s1 = scalar_lea.vmem [#allocation4], %s159_s21  ;;  %s165_s6 = sld [smem:[#allocation3 + $0x9]] }
  0x1d   :  { %33 = vst [vmem:[#allocation7] sm:$0x1] %v32_v1  ;;  %v44_v5 = vmul.f32 11.313708, %v43_v4  ;;  %v49_v6 = vld [vmem:[%s48_s1] sm:$0x1] }
  0x1e   :  { %39 = vst [vmem:[#allocation7 + $0x1] sm:$0x1] %v38_v3  ;;  %v50_v7 = vmul.f32 11.313708, %v49_v6  ;;  %s54_s29 = scalar_lea.vmem [#allocation4], %s160_s22  ;;  %s60_s30 = scalar_lea.vmem [#allocation4], %s161_s23 }
  0x1f   :  { %v55_v8 = vld [vmem:[%s54_s29] sm:$0x1]  ;;  %45 = vst [vmem:[#allocation7 + $0x2] sm:$0x1] %v44_v5  ;;  %s66_s3 = scalar_lea.vmem [#allocation4], %s162_s24  ;;  %s166_s7 = sld [smem:[#allocation3 + $0xa]] }
  0x20   :  { %v56_v9 = vmul.f32 11.313708, %v55_v8  ;;  %v61_v10 = vld [vmem:[%s60_s30] sm:$0x1]  ;;  %51 = vst [vmem:[#allocation7 + $0x3] sm:$0x1] %v50_v7 }
  0x21   :  { %v62_v11 = vmul.f32 11.313708, %v61_v10  ;;  %v67_v12 = vld [vmem:[%s66_s3] sm:$0x1]  ;;  %s72_s4 = scalar_lea.vmem [#allocation4], %s163_s26  ;;  %s167_s8 = sld [smem:[#allocation3 + $0xb]] }
  0x22   :  { %57 = vst [vmem:[#allocation7 + $0x4] sm:$0x1] %v56_v9  ;;  %v68_v13 = vmul.f32 11.313708, %v67_v12  ;;  %v73_v14 = vld [vmem:[%s72_s4] sm:$0x1] }
  0x23   :  { %63 = vst [vmem:[#allocation7 + $0x5] sm:$0x1] %v62_v11  ;;  %v74_v15 = vmul.f32 11.313708, %v73_v14  ;;  %s168_s9 = sld [smem:[#allocation3 + $0xc]]  ;;  %s78_s12 = scalar_lea.vmem [#allocation4], %s164_s5 }
  0x24   :  { %69 = vst [vmem:[#allocation7 + $0x6] sm:$0x1] %v68_v13  ;;  %s169_s10 = sld [smem:[#allocation3 + $0xd]]  ;;  %v79_v16 = vld [vmem:[%s78_s12] sm:$0x1]  ;;  %s84_s14 = scalar_lea.vmem [#allocation4], %s165_s6 }
  0x25   :  { %75 = vst [vmem:[#allocation7 + $0x7] sm:$0x1] %v74_v15  ;;  %s170_s11 = sld [smem:[#allocation3 + $0xe]]  ;;  %v80_v17 = vmul.f32 11.313708, %v79_v16  ;;  %s90_s0 = scalar_lea.vmem [#allocation4], %s166_s7 }
  0x26   :  { %s171_s13 = sld [smem:[#allocation3 + $0xf]]  ;;  %v85_v18 = vld [vmem:[%s84_s14] sm:$0x1]  ;;  %s235_s20 = smov [#allocation7]  }
  0x27   :  { %v86_v19 = vmul.f32 11.313708, %v85_v18  ;;  %v91_v20 = vld [vmem:[%s90_s0] sm:$0x1]  ;;  %81 = vst [vmem:[#allocation7 + $0x8] sm:$0x1] %v80_v17 }
  0x28   :  { %v92_v21 = vmul.f32 11.313708, %v91_v20  ;;  %s96_s17 = scalar_lea.vmem [#allocation4], %s167_s8  ;;  %s129_s21 = sshll.u32 %s235_s20, 4  ;;  %s130_s21 = int_to_ptr.vmem [resolvable:$true] %s129_s21 }
  0x29   :  { %v97_v22 = vld [vmem:[%s96_s17] sm:$0x1]  ;;  %87 = vst [vmem:[#allocation7 + $0x9] sm:$0x1] %v86_v19  ;;  %s102_s18 = scalar_lea.vmem [#allocation4], %s168_s9  ;;  %s205_s24 = scalar_lea.vmem %s130_s21, 256 }
  0x2a   :  { %v98_v23 = vmul.f32 11.313708, %v97_v22  ;;  %v103_v24 = vld [vmem:[%s102_s18] sm:$0x1]  ;;  %93 = vst [vmem:[#allocation7 + $0xa] sm:$0x1] %v92_v21  ;;  %p206_p5 = scmp.ne.s32.totalorder %s130_s21, %s205_s24  ;;  %p210_p6 = scmp.lt.s32.totalorder %s130_s21, %s130_s21 }
  0x2b   :  { %v104_v25 = vmul.f32 11.313708, %v103_v24  ;;  %s108_s19 = scalar_lea.vmem [#allocation4], %s169_s10  ;;  %s114_s22 = scalar_lea.vmem [#allocation4], %s170_s11 }
  0x2c   :  { %v109_v26 = vld [vmem:[%s108_s19] sm:$0x1]  ;;  %99 = vst [vmem:[#allocation7 + $0xb] sm:$0x1] %v98_v23  ;;  %s120_s23 = scalar_lea.vmem [#allocation4], %s171_s13  ;;  %p211_p7 = scmp.lt.s32.totalorder %s205_s24, %s205_s24 }
  0x2d   :  { %v110_v27 = vmul.f32 11.313708, %v109_v26  ;;  %v115_v28 = vld [vmem:[%s114_s22] sm:$0x1]  ;;  %105 = vst [vmem:[#allocation7 + $0xc] sm:$0x1] %v104_v25 }
  0x2e   :  { %v116_v29 = vmul.f32 11.313708, %v115_v28  ;;  %v121_v30 = vld [vmem:[%s120_s23] sm:$0x1]  ;;  %p212_p8 = por %p211_p7, %p210_p6 }
  0x2f   :  { %111 = vst [vmem:[#allocation7 + $0xd] sm:$0x1] %v110_v27  ;;  %v122_v31 = vmul.f32 11.313708, %v121_v30 }
  0x30   :  { %117 = vst [vmem:[#allocation7 + $0xe] sm:$0x1] %v116_v29  ;;  %p213_p9 = pnand %p212_p8, %p206_p5 }
  0x31   :  { %123 = vst [vmem:[#allocation7 + $0xf] sm:$0x1] %v122_v31 }
  0x32   :  { %216 = shalt.err (!%p213_p9)
}
  0x33   :  { %135 = dma.vmem_to_hbm [thread:$0]  %s130_s21, 256, %s268_s2, [#allocation6], %s233_s15, %s233_s15, %s234_s16  }
  0x34   :  { %229 = dma.done.wait [#allocation6], 256  }
  0x35   :  { %230 = vsyncadd [#allocation6], 4294967040 }
  0x36   :  { %139 = vsyncpa [#allocation5], 1 }
  0x37   :  { %140 = vsyncpa [#allocation6], 1 }

</bundles_post_ra>
